<compile_context>
chip_gen: v7x
topology: tpu7x:2x2x1
jax: 0.10.0
libtpu: 0.0.40
codegen_flags: <defaults>
</compile_context>

<pallas_src>
import functools

import jax
import jax.numpy as jnp
from jax import lax
from jax.experimental import pallas as pl
from jax.experimental.pallas import tpu as pltpu


def additive_attention_kernel(valid_ref,                   # SMEM (B,) int32 (scalar prefetch)
                              qT_ref, kT_ref, v_ref,       # VMEM (Dq,TB*Q), (Dk,TB*K), (TB,K,Dv)
                              wqT_ref, wkT_ref, wv_ref,    # VMEM (H,Dq), (H,Dk), (H,1)
                              *refs,                       # out (TB,Q,Dv)[, attn (TB,Q,K)], scratch
                              return_attn, feature_dtype, h_chunk):
    if return_attn:
        out_ref, attn_ref, qpT_scr, kpT_scr = refs
    else:
        out_ref, qpT_scr, kpT_scr = refs
        attn_ref = None

    TB, K, _ = v_ref.shape
    Q = out_ref.shape[1]
    H = wv_ref.shape[0]
    b0 = pl.program_id(0)

    # Fused H-major projections for the whole batch tile: two MXU matmuls whose
    # outputs land in VMEM scratch already "transposed" (H on the sublane axis).
    qpT_scr[...] = jnp.dot(wqT_ref[...], qT_ref[...],
                           preferred_element_type=jnp.float32)       # (H, TB*Q)
    kpT_scr[...] = jnp.dot(wkT_ref[...], kT_ref[...],
                           preferred_element_type=jnp.float32)       # (H, TB*K)

    col = lax.broadcasted_iota(jnp.int32, (Q, K), 1)                 # hoisted, shared by all batches

    for t in range(TB):                                              # static; per-t work reads small ref slices
        # H-chunked score accumulation: never materialize (Q, H, K).
        scores = jnp.zeros((Q, K), jnp.float32)
        for h0 in range(0, H, h_chunk):
            ch = min(h_chunk, H - h0)
            qc = qpT_scr[h0:h0 + ch, t * Q:(t + 1) * Q]              # (ch, Q)  static slice
            kc = kpT_scr[h0:h0 + ch, t * K:(t + 1) * K]              # (ch, K)  static slice
            wc = wv_ref[h0:h0 + ch, :]                               # (ch, 1)
            # Feature chunk (Q, ch, K): K lane-dense (softmax axis), H-chunk on
            # sublanes.  The key / w_v chunks broadcast for free in this
            # orientation; only the small (ch, Q) query chunk is transposed.
            qcT = qc.T.astype(feature_dtype)                         # (Q, ch)
            feat = jnp.tanh(qcT[:, :, None] + kc[None, :, :].astype(feature_dtype))
            weighted = (wc[None, :, :].astype(feature_dtype) * feat).astype(jnp.float32)
            scores = scores + jnp.sum(weighted, axis=1)              # (Q, K) f32 accumulator

        # Masked softmax over the key axis (f32 throughout; mask value matches
        # the reference's -1e6.  valid_len == 0 gives a uniform distribution,
        # same as d2l's masked_softmax.)
        v_len = valid_ref[b0 * TB + t]
        scores = jnp.where(col < v_len, scores, jnp.float32(-1e6))
        m = jnp.max(scores, axis=-1, keepdims=True)
        e = jnp.exp(scores - m)
        denom = jnp.sum(e, axis=-1, keepdims=True)
        attn = e * pl.reciprocal(denom, approx=True)                 # EUP reciprocal

        if attn_ref is not None:
            attn_ref[t] = attn.astype(attn_ref.dtype)
        # bmm(attention_weights, values); dropout == identity in eval mode.
        # TODO(synk): for serving sizes, pad Dv / K to multiples of 128 in the
        # wrapper so these stores are lane-dense (unmasked vst).
        out_ref[t] = jnp.dot(attn, v_ref[t],
                             preferred_element_type=jnp.float32).astype(out_ref.dtype)


def _per_step_vmem_bytes(TB, Q, K, Dq, Dk, Dv, H, h_chunk, return_attn, attn_itemsize=4):
    """Rough per-grid-step VMEM working set (f32 inputs)."""
    isz = 4
    blocks = (Dq * TB * Q + Dk * TB * K + TB * K * Dv + TB * Q * Dv) * isz
    if return_attn:
        blocks += TB * Q * K * attn_itemsize
    weights = (H * Dq + H * Dk + H) * isz
    scratch = H * TB * (Q + K) * isz
    feat = 3 * Q * h_chunk * K * isz          # feature chunk + broadcast temporaries
    return 2 * blocks + weights + scratch + feat   # BlockSpec blocks are double-buffered


def _pick_batch_tile(B, Q, K, Dq, Dk, Dv, H, h_chunk, *, return_attn,
                     vmem_budget=28 << 20):
    """Pick TB: divides B, keeps the (Dq, TB*Q)/(Dk, TB*K) lane blocks legal
    (multiple of 128 or the full array), fits the VMEM budget, and prefers a
    tile that fills the MXU (>=256 fused-projection columns; 128 already
    saturates v5e) while leaving grid >= 2 for megacore (v7x)."""
    def legal(t):
        return B % t == 0 and (t == B or ((t * Q) % 128 == 0 and (t * K) % 128 == 0))

    legal_tiles = [t for t in range(1, B + 1) if legal(t)]
    fitting = [t for t in legal_tiles
               if _per_step_vmem_bytes(t, Q, K, Dq, Dk, Dv, H, h_chunk,
                                       return_attn) <= vmem_budget]
    if not fitting:
        fitting = legal_tiles[:1]
    for t in fitting:
        if t * Q >= 256 and t * K >= 256 and (B // t) >= 2:
            return t
    for t in fitting:
        if t * Q >= 256 and t * K >= 256:
            return t
    return fitting[-1]


@functools.partial(jax.jit, static_argnames=("batch_tile", "h_chunk", "return_attn",
                                             "feature_dtype", "attn_dtype"))
def additive_attention(queries, keys, values, valid_lens, W_q, W_k, w_v, *,
                       batch_tile=None, h_chunk=None, return_attn=True,
                       feature_dtype=jnp.float32, attn_dtype=jnp.float32):
    """queries (B,Q,Dq), keys (B,K,Dk), values (B,K,Dv), valid_lens (B,) int or None."""
    B, Q, Dq = queries.shape
    _, K, Dk = keys.shape
    _, _, Dv = values.shape
    H = W_q.shape[1]
    # TODO(synk): 2-D valid_lens (per-query lengths) not wired here; 1-D (per-batch) only.
    if valid_lens is None:
        valid_lens = jnp.full((B,), K, dtype=jnp.int32)
    valid_lens = valid_lens.astype(jnp.int32)

    CH = min(H, 32) if h_chunk is None else h_chunk
    TB = (_pick_batch_tile(B, Q, K, Dq, Dk, Dv, H, CH, return_attn=return_attn)
          if batch_tile is None else batch_tile)
    assert B % TB == 0, "batch_tile must divide the batch size"
    grid = (B // TB,)

    # H-major (transposed) inputs: the fused in-kernel projections come out
    # (H, .) with H on sublanes and the batch*seq axis lane-dense — no
    # in-kernel transposes of the key projection.
    qT2d = jnp.transpose(queries, (2, 0, 1)).reshape(Dq, B * Q)
    kT2d = jnp.transpose(keys, (2, 0, 1)).reshape(Dk, B * K)
    wqT = W_q.T                                   # (H, Dq)
    wkT = W_k.T                                   # (H, Dk)
    wv_col = w_v.reshape(H, 1)

    in_specs = [
        pl.BlockSpec((Dq, TB * Q), lambda b, vl: (0, b)),
        pl.BlockSpec((Dk, TB * K), lambda b, vl: (0, b)),
        pl.BlockSpec((TB, K, Dv), lambda b, vl: (b, 0, 0)),
        pl.BlockSpec((H, Dq), lambda b, vl: (0, 0)),
        pl.BlockSpec((H, Dk), lambda b, vl: (0, 0)),
        pl.BlockSpec((H, 1), lambda b, vl: (0, 0)),
    ]
    out_specs = (pl.BlockSpec((TB, Q, Dv), lambda b, vl: (b, 0, 0)),)
    out_shape = (jax.ShapeDtypeStruct((B, Q, Dv), jnp.float32),)
    if return_attn:
        out_specs += (pl.BlockSpec((TB, Q, K), lambda b, vl: (b, 0, 0)),)
        out_shape += (jax.ShapeDtypeStruct((B, Q, K), attn_dtype),)

    attn_isz = jnp.dtype(attn_dtype).itemsize
    working = _per_step_vmem_bytes(TB, Q, K, Dq, Dk, Dv, H, CH, return_attn,
                                   attn_itemsize=attn_isz)
    vmem_limit = int(min(64 << 20, max(working + (4 << 20), 16 << 20)))

    flops = (2 * B * (Q * Dq * H + K * Dk * H)      # projections
             + 3 * B * Q * K * H                    # broadcast-add, w_v mul, accumulate
             + 2 * B * Q * K * Dv                   # context bmm
             + 6 * B * Q * K)                       # masked softmax
    transcendentals = B * Q * K * H + B * Q * K     # tanh + exp
    bytes_accessed = (4 * (B * Q * Dq + B * K * Dk + B * K * Dv
                           + Dq * H + Dk * H + H + B * Q * Dv) + 4 * B
                      + (attn_isz * B * Q * K if return_attn else 0))
    cost = pl.CostEstimate(flops=flops, transcendentals=transcendentals,
                           bytes_accessed=bytes_accessed)

    kernel = functools.partial(additive_attention_kernel,
                               return_attn=return_attn,
                               feature_dtype=feature_dtype,
                               h_chunk=CH)

    grid_spec = pltpu.PrefetchScalarGridSpec(
        num_scalar_prefetch=1,
        grid=grid,
        in_specs=in_specs,
        out_specs=out_specs,
        scratch_shapes=[pltpu.VMEM((H, TB * Q), jnp.float32),
                        pltpu.VMEM((H, TB * K), jnp.float32)],
    )

    results = pl.pallas_call(
        kernel,
        grid_spec=grid_spec,
        out_shape=out_shape,
        compiler_params=pltpu.CompilerParams(
            dimension_semantics=("parallel",),
            vmem_limit_bytes=vmem_limit),
        cost_estimate=cost,
    )(valid_lens, qT2d, kT2d, values, wqT, wkT, wv_col)

    if return_attn:
        out, attn = results
        return out, attn
    (out,) = results
    return out


def reference(queries, keys, values, valid_lens, W_q, W_k, w_v):
    qp = queries @ W_q
    kp = keys @ W_k
    feat = jnp.tanh(qp[:, :, None, :] + kp[:, None, :, :])
    scores = (feat @ w_v.reshape(-1, 1))[..., 0]                    # (B, Q, K)
    col = jnp.arange(scores.shape[-1])[None, None, :]
    scores = jnp.where(col < valid_lens[:, None, None], scores, -1e6)
    attn = jax.nn.softmax(scores, axis=-1)
    return attn @ values, attn


if __name__ == "__main__":
    # Small deterministic shapes consistent with the module's forward.
    B, Q, K = 2, 4, 8
    Dq, Dk, H, Dv = 20, 16, 32, 4

    key = jax.random.PRNGKey(0)
    kq, kk, kv, kwq, kwk, kwv = jax.random.split(key, 6)

    queries = jax.random.normal(kq, (B, Q, Dq), dtype=jnp.float32)
    keys_ = jax.random.normal(kk, (B, K, Dk), dtype=jnp.float32)
    values = jax.random.normal(kv, (B, K, Dv), dtype=jnp.float32)
    valid_lens = jnp.array([3, 6], dtype=jnp.int32)

    # Deterministic parameter init (stored transposed vs. nn.Linear's (out, in)).
    W_q = jax.random.normal(kwq, (Dq, H), dtype=jnp.float32) * 0.1
    W_k = jax.random.normal(kwk, (Dk, H), dtype=jnp.float32) * 0.1
    w_v = jax.random.normal(kwv, (H, 1), dtype=jnp.float32) * 0.1

    ref_out, ref_attn = reference(queries, keys_, values, valid_lens, W_q, W_k, w_v)

    # f32 feature path (default; correct on all generations incl. v5e).
    out, attn = additive_attention(queries, keys_, values, valid_lens,
                                   W_q, W_k, w_v, return_attn=True)
    out = jax.block_until_ready(out)
    attn = jax.block_until_ready(attn)
    # Tolerance accounts for the EUP approx reciprocal in the softmax denominator.
    assert jnp.allclose(out, ref_out, atol=2e-3, rtol=2e-3), "context output mismatch"
    assert jnp.allclose(attn, ref_attn, atol=2e-3, rtol=2e-3), "attention weights mismatch"

    # Context-only path (skips the (B, Q, K) attention-weights HBM writeback).
    out_only = additive_attention(queries, keys_, values, valid_lens,
                                  W_q, W_k, w_v, return_attn=False)
    out_only = jax.block_until_ready(out_only)
    assert jnp.allclose(out_only, ref_out, atol=2e-3, rtol=2e-3), "no-attn output mismatch"

    # bf16 feature path (v6e/v7x optimization); softmax/masking stay f32.
    out_bf, attn_bf = additive_attention(queries, keys_, values, valid_lens,
                                         W_q, W_k, w_v, return_attn=True,
                                         feature_dtype=jnp.bfloat16,
                                         attn_dtype=jnp.bfloat16)
    out_bf = jax.block_until_ready(out_bf)
    attn_bf = jax.block_until_ready(attn_bf)
    assert jnp.allclose(out_bf, ref_out, atol=2e-2, rtol=2e-2), "bf16 output mismatch"
    assert jnp.allclose(attn_bf.astype(jnp.float32), ref_attn,
                        atol=2e-2, rtol=2e-2), "bf16 attention weights mismatch"

    print("KERNEL_OK")
</pallas_src>

<mosaic_0001>
module attributes {stable_mosaic.version = 11 : i64} {
  func.func @additive_attention_kernel(%arg0: i32, %arg1: memref<2xi32, #tpu.memory_space<smem>>, %arg2: memref<20x8xf32, #tpu.memory_space<vmem>>, %arg3: memref<16x16xf32, #tpu.memory_space<vmem>>, %arg4: memref<2x8x4xf32, #tpu.memory_space<vmem>>, %arg5: memref<32x20xf32, #tpu.memory_space<vmem>>, %arg6: memref<32x16xf32, #tpu.memory_space<vmem>>, %arg7: memref<32x1xf32, #tpu.memory_space<vmem>>, %arg8: memref<2x4x4xf32, #tpu.memory_space<vmem>>, %arg9: memref<2x4x8xf32, #tpu.memory_space<vmem>>, %arg10: memref<32x8xf32, #tpu.memory_space<vmem>>, %arg11: memref<32x16xf32, #tpu.memory_space<vmem>>) attributes {dimension_semantics = [#tpu.dimension_semantics<parallel>], iteration_bounds = array<i64: 1>, scalar_prefetch = 1 : i64, scratch_operands = 2 : i64, tpu.core_type = #tpu.core_type<tc>, window_params = [{transform_indices = @transform_0, window_bounds = array<i64: 20, 8>}, {transform_indices = @transform_1, window_bounds = array<i64: 16, 16>}, {transform_indices = @transform_2, window_bounds = array<i64: 2, 8, 4>}, {pipeline_mode = #tpu.pipeline_mode<synchronous>, transform_indices = @transform_3, window_bounds = array<i64: 32, 20>}, {pipeline_mode = #tpu.pipeline_mode<synchronous>, transform_indices = @transform_4, window_bounds = array<i64: 32, 16>}, {pipeline_mode = #tpu.pipeline_mode<synchronous>, transform_indices = @transform_5, window_bounds = array<i64: 32, 1>}, {transform_indices = @transform_6, window_bounds = array<i64: 2, 4, 4>}, {transform_indices = @transform_7, window_bounds = array<i64: 2, 4, 8>}]} {
    %c0 = arith.constant 0 : index
    %c0_0 = arith.constant 0 : index
    %0 = vector.load %arg5[%c0, %c0_0] : memref<32x20xf32, #tpu.memory_space<vmem>>, vector<32x20xf32>
    %c0_1 = arith.constant 0 : index
    %c0_2 = arith.constant 0 : index
    %1 = vector.load %arg2[%c0_1, %c0_2] : memref<20x8xf32, #tpu.memory_space<vmem>>, vector<20x8xf32>
    %cst = arith.constant dense<0.000000e+00> : vector<32x8xf32>
    %2 = tpu.matmul %0, %1, %cst {dimension_numbers = #tpu.dot_dimension_numbers<[1], [0], [0], [1], [0, 0, 1, 1], [], []>} : vector<32x20xf32>, vector<20x8xf32>, vector<32x8xf32> -> vector<32x8xf32>
    %c0_3 = arith.constant 0 : index
    %c0_4 = arith.constant 0 : index
    %3 = vector.load %arg10[%c0_3, %c0_4] : memref<32x8xf32, #tpu.memory_space<vmem>>, vector<32x8xf32>
    tpu.vector_store %arg10[%c0_3, %c0_4], %2 {strides = array<i32>} : memref<32x8xf32, #tpu.memory_space<vmem>>, vector<32x8xf32>,
    %c0_5 = arith.constant 0 : index
    %c0_6 = arith.constant 0 : index
    %4 = vector.load %arg6[%c0_5, %c0_6] : memref<32x16xf32, #tpu.memory_space<vmem>>, vector<32x16xf32>
    %c0_7 = arith.constant 0 : index
    %c0_8 = arith.constant 0 : index
    %5 = vector.load %arg3[%c0_7, %c0_8] : memref<16x16xf32, #tpu.memory_space<vmem>>, vector<16x16xf32>
    %cst_9 = arith.constant dense<0.000000e+00> : vector<32x16xf32>
    %6 = tpu.matmul %4, %5, %cst_9 {dimension_numbers = #tpu.dot_dimension_numbers<[1], [0], [0], [1], [0, 0, 1, 1], [], []>} : vector<32x16xf32>, vector<16x16xf32>, vector<32x16xf32> -> vector<32x16xf32>
    %c0_10 = arith.constant 0 : index
    %c0_11 = arith.constant 0 : index
    %7 = vector.load %arg11[%c0_10, %c0_11] : memref<32x16xf32, #tpu.memory_space<vmem>>, vector<32x16xf32>
    tpu.vector_store %arg11[%c0_10, %c0_11], %6 {strides = array<i32>} : memref<32x16xf32, #tpu.memory_space<vmem>>, vector<32x16xf32>,
    %8 = tpu.iota {dimensions = array<i32: 1>} : vector<4x8xi32>
    %cst_12 = arith.constant 0.000000e+00 : f32
    %9 = vector.broadcast %cst_12 : f32 to vector<4x8xf32>
    %c0_13 = arith.constant 0 : index
    %c0_14 = arith.constant 0 : index
    %10 = vector.load %arg10[%c0_13, %c0_14] : memref<32x8xf32, #tpu.memory_space<vmem>>, vector<32x4xf32>
    %c0_15 = arith.constant 0 : index
    %c0_16 = arith.constant 0 : index
    %11 = vector.load %arg11[%c0_15, %c0_16] : memref<32x16xf32, #tpu.memory_space<vmem>>, vector<32x8xf32>
    %c0_17 = arith.constant 0 : index
    %c0_18 = arith.constant 0 : index
    %12 = vector.load %arg7[%c0_17, %c0_18] : memref<32x1xf32, #tpu.memory_space<vmem>>, vector<32x1xf32>
    %13 = tpu.transpose %10, [1, 0] : vector<32x4xf32> -> vector<4x32xf32>
    %14 = vector.shape_cast %13 : vector<4x32xf32> to vector<4x32x1xf32>
    %15 = vector.shape_cast %11 : vector<32x8xf32> to vector<1x32x8xf32>
    %16 = vector.broadcast %14 : vector<4x32x1xf32> to vector<4x32x8xf32>
    %17 = vector.broadcast %15 : vector<1x32x8xf32> to vector<4x32x8xf32>
    %18 = arith.addf %16, %17 : vector<4x32x8xf32>
    %19 = math.tanh %18 : vector<4x32x8xf32>
    %20 = vector.shape_cast %12 : vector<32x1xf32> to vector<1x32x1xf32>
    %21 = vector.broadcast %20 : vector<1x32x1xf32> to vector<4x32x8xf32>
    %22 = arith.mulf %21, %19 : vector<4x32x8xf32>
    %cst_19 = arith.constant dense<0.000000e+00> : vector<4x8xf32>
    %23 = vector.multi_reduction <add>, %22, %cst_19 [1] : vector<4x32x8xf32> to vector<4x8xf32>
    %24 = arith.addf %9, %23 : vector<4x8xf32>
    %c2_i32 = arith.constant 2 : i32
    %25 = arith.muli %arg0, %c2_i32 : i32
    %c0_i32 = arith.constant 0 : i32
    %26 = arith.addi %25, %c0_i32 : i32
    %27 = arith.index_cast %26 : i32 to index
    %28 = memref.load %arg1[%27] : memref<2xi32, #tpu.memory_space<smem>>
    %29 = vector.broadcast %28 : i32 to vector<4x8xi32>
    %30 = arith.cmpi slt, %8, %29 : vector<4x8xi32>
    %cst_20 = arith.constant -1.000000e+06 : f32
    %31 = vector.broadcast %cst_20 : f32 to vector<4x8xf32>
    %32 = arith.select %30, %24, %31 : vector<4x8xi1>, vector<4x8xf32>
    %cst_21 = arith.constant dense<0xFF800000> : vector<4xf32>
    %33 = vector.multi_reduction <maximumf>, %32, %cst_21 [1] : vector<4x8xf32> to vector<4xf32>
    %34 = vector.shape_cast %33 : vector<4xf32> to vector<4x1xf32>
    %35 = vector.broadcast %34 : vector<4x1xf32> to vector<4x8xf32>
    %36 = arith.subf %32, %35 : vector<4x8xf32>
    %37 = math.exp %36 : vector<4x8xf32>
    %cst_22 = arith.constant dense<0.000000e+00> : vector<4xf32>
    %38 = vector.multi_reduction <add>, %37, %cst_22 [1] : vector<4x8xf32> to vector<4xf32>
    %39 = vector.shape_cast %38 : vector<4xf32> to vector<4x1xf32>
    %40 = tpu.reciprocal %39 {approx = true} : vector<4x1xf32> -> vector<4x1xf32>
    %41 = vector.broadcast %40 : vector<4x1xf32> to vector<4x8xf32>
    %42 = arith.mulf %37, %41 : vector<4x8xf32>
    %c0_23 = arith.constant 0 : index
    %c0_24 = arith.constant 0 : index
    %c0_25 = arith.constant 0 : index
    %43 = vector.load %arg9[%c0_23, %c0_24, %c0_25] : memref<2x4x8xf32, #tpu.memory_space<vmem>>, vector<1x4x8xf32>
    %44 = vector.shape_cast %43 : vector<1x4x8xf32> to vector<4x8xf32>
    %45 = vector.shape_cast %42 : vector<4x8xf32> to vector<1x4x8xf32>
    tpu.vector_store %arg9[%c0_23, %c0_24, %c0_25], %45 {strides = array<i32>} : memref<2x4x8xf32, #tpu.memory_space<vmem>>, vector<1x4x8xf32>,
    %c0_26 = arith.constant 0 : index
    %c0_27 = arith.constant 0 : index
    %c0_28 = arith.constant 0 : index
    %46 = vector.load %arg4[%c0_26, %c0_27, %c0_28] : memref<2x8x4xf32, #tpu.memory_space<vmem>>, vector<1x8x4xf32>
    %47 = vector.shape_cast %46 : vector<1x8x4xf32> to vector<8x4xf32>
    %cst_29 = arith.constant dense<0.000000e+00> : vector<4x4xf32>
    %48 = tpu.matmul %42, %47, %cst_29 {dimension_numbers = #tpu.dot_dimension_numbers<[1], [0], [0], [1], [0, 0, 1, 1], [], []>} : vector<4x8xf32>, vector<8x4xf32>, vector<4x4xf32> -> vector<4x4xf32>
    %c0_30 = arith.constant 0 : index
    %c0_31 = arith.constant 0 : index
    %c0_32 = arith.constant 0 : index
    %49 = vector.load %arg8[%c0_30, %c0_31, %c0_32] : memref<2x4x4xf32, #tpu.memory_space<vmem>>, vector<1x4x4xf32>
    %50 = vector.shape_cast %49 : vector<1x4x4xf32> to vector<4x4xf32>
    %51 = vector.shape_cast %48 : vector<4x4xf32> to vector<1x4x4xf32>
    tpu.vector_store %arg8[%c0_30, %c0_31, %c0_32], %51 {strides = array<i32>} : memref<2x4x4xf32, #tpu.memory_space<vmem>>, vector<1x4x4xf32>,
    %cst_33 = arith.constant 0.000000e+00 : f32
    %52 = vector.broadcast %cst_33 : f32 to vector<4x8xf32>
    %c0_34 = arith.constant 0 : index
    %c4 = arith.constant 4 : index
    %53 = vector.load %arg10[%c0_34, %c4] : memref<32x8xf32, #tpu.memory_space<vmem>>, vector<32x4xf32>
    %c0_35 = arith.constant 0 : index
    %c8 = arith.constant 8 : index
    %54 = vector.load %arg11[%c0_35, %c8] : memref<32x16xf32, #tpu.memory_space<vmem>>, vector<32x8xf32>
    %c0_36 = arith.constant 0 : index
    %c0_37 = arith.constant 0 : index
    %55 = vector.load %arg7[%c0_36, %c0_37] : memref<32x1xf32, #tpu.memory_space<vmem>>, vector<32x1xf32>
    %56 = tpu.transpose %53, [1, 0] : vector<32x4xf32> -> vector<4x32xf32>
    %57 = vector.shape_cast %56 : vector<4x32xf32> to vector<4x32x1xf32>
    %58 = vector.shape_cast %54 : vector<32x8xf32> to vector<1x32x8xf32>
    %59 = vector.broadcast %57 : vector<4x32x1xf32> to vector<4x32x8xf32>
    %60 = vector.broadcast %58 : vector<1x32x8xf32> to vector<4x32x8xf32>
    %61 = arith.addf %59, %60 : vector<4x32x8xf32>
    %62 = math.tanh %61 : vector<4x32x8xf32>
    %63 = vector.shape_cast %55 : vector<32x1xf32> to vector<1x32x1xf32>
    %64 = vector.broadcast %63 : vector<1x32x1xf32> to vector<4x32x8xf32>
    %65 = arith.mulf %64, %62 : vector<4x32x8xf32>
    %cst_38 = arith.constant dense<0.000000e+00> : vector<4x8xf32>
    %66 = vector.multi_reduction <add>, %65, %cst_38 [1] : vector<4x32x8xf32> to vector<4x8xf32>
    %67 = arith.addf %52, %66 : vector<4x8xf32>
    %c2_i32_39 = arith.constant 2 : i32
    %68 = arith.muli %arg0, %c2_i32_39 : i32
    %c1_i32 = arith.constant 1 : i32
    %69 = arith.addi %68, %c1_i32 : i32
    %70 = arith.index_cast %69 : i32 to index
    %71 = memref.load %arg1[%70] : memref<2xi32, #tpu.memory_space<smem>>
    %72 = vector.broadcast %71 : i32 to vector<4x8xi32>
    %73 = arith.cmpi slt, %8, %72 : vector<4x8xi32>
    %cst_40 = arith.constant -1.000000e+06 : f32
    %74 = vector.broadcast %cst_40 : f32 to vector<4x8xf32>
    %75 = arith.select %73, %67, %74 : vector<4x8xi1>, vector<4x8xf32>
    %cst_41 = arith.constant dense<0xFF800000> : vector<4xf32>
    %76 = vector.multi_reduction <maximumf>, %75, %cst_41 [1] : vector<4x8xf32> to vector<4xf32>
    %77 = vector.shape_cast %76 : vector<4xf32> to vector<4x1xf32>
    %78 = vector.broadcast %77 : vector<4x1xf32> to vector<4x8xf32>
    %79 = arith.subf %75, %78 : vector<4x8xf32>
    %80 = math.exp %79 : vector<4x8xf32>
    %cst_42 = arith.constant dense<0.000000e+00> : vector<4xf32>
    %81 = vector.multi_reduction <add>, %80, %cst_42 [1] : vector<4x8xf32> to vector<4xf32>
    %82 = vector.shape_cast %81 : vector<4xf32> to vector<4x1xf32>
    %83 = tpu.reciprocal %82 {approx = true} : vector<4x1xf32> -> vector<4x1xf32>
    %84 = vector.broadcast %83 : vector<4x1xf32> to vector<4x8xf32>
    %85 = arith.mulf %80, %84 : vector<4x8xf32>
    %c1 = arith.constant 1 : index
    %c0_43 = arith.constant 0 : index
    %c0_44 = arith.constant 0 : index
    %86 = vector.load %arg9[%c1, %c0_43, %c0_44] : memref<2x4x8xf32, #tpu.memory_space<vmem>>, vector<1x4x8xf32>
    %87 = vector.shape_cast %86 : vector<1x4x8xf32> to vector<4x8xf32>
    %88 = vector.shape_cast %85 : vector<4x8xf32> to vector<1x4x8xf32>
    tpu.vector_store %arg9[%c1, %c0_43, %c0_44], %88 {strides = array<i32>} : memref<2x4x8xf32, #tpu.memory_space<vmem>>, vector<1x4x8xf32>,
    %c1_45 = arith.constant 1 : index
    %c0_46 = arith.constant 0 : index
    %c0_47 = arith.constant 0 : index
    %89 = vector.load %arg4[%c1_45, %c0_46, %c0_47] : memref<2x8x4xf32, #tpu.memory_space<vmem>>, vector<1x8x4xf32>
    %90 = vector.shape_cast %89 : vector<1x8x4xf32> to vector<8x4xf32>
    %cst_48 = arith.constant dense<0.000000e+00> : vector<4x4xf32>
    %91 = tpu.matmul %85, %90, %cst_48 {dimension_numbers = #tpu.dot_dimension_numbers<[1], [0], [0], [1], [0, 0, 1, 1], [], []>} : vector<4x8xf32>, vector<8x4xf32>, vector<4x4xf32> -> vector<4x4xf32>
    %c1_49 = arith.constant 1 : index
    %c0_50 = arith.constant 0 : index
    %c0_51 = arith.constant 0 : index
    %92 = vector.load %arg8[%c1_49, %c0_50, %c0_51] : memref<2x4x4xf32, #tpu.memory_space<vmem>>, vector<1x4x4xf32>
    %93 = vector.shape_cast %92 : vector<1x4x4xf32> to vector<4x4xf32>
    %94 = vector.shape_cast %91 : vector<4x4xf32> to vector<1x4x4xf32>
    tpu.vector_store %arg8[%c1_49, %c0_50, %c0_51], %94 {strides = array<i32>} : memref<2x4x4xf32, #tpu.memory_space<vmem>>, vector<1x4x4xf32>,
    return
  }
  func.func @transform_0(%arg0: i32, %arg1: memref<2xi32, #tpu.memory_space<smem>>) -> (i32, i32) {
    %c0_i32 = arith.constant 0 : i32
    %c0_i32_0 = arith.constant 0 : i32
    return %c0_i32, %arg0 : i32, i32
  }
  func.func @transform_1(%arg0: i32, %arg1: memref<2xi32, #tpu.memory_space<smem>>) -> (i32, i32) {
    %c0_i32 = arith.constant 0 : i32
    %c0_i32_0 = arith.constant 0 : i32
    return %c0_i32, %arg0 : i32, i32
  }
  func.func @transform_2(%arg0: i32, %arg1: memref<2xi32, #tpu.memory_space<smem>>) -> (i32, i32, i32) {
    %c0_i32 = arith.constant 0 : i32
    %c0_i32_0 = arith.constant 0 : i32
    %c0_i32_1 = arith.constant 0 : i32
    return %arg0, %c0_i32, %c0_i32_0 : i32, i32, i32
  }
  func.func @transform_3(%arg0: i32, %arg1: memref<2xi32, #tpu.memory_space<smem>>) -> (i32, i32) {
    %c0_i32 = arith.constant 0 : i32
    %c0_i32_0 = arith.constant 0 : i32
    %c0_i32_1 = arith.constant 0 : i32
    return %c0_i32, %c0_i32_0 : i32, i32
  }
  func.func @transform_4(%arg0: i32, %arg1: memref<2xi32, #tpu.memory_space<smem>>) -> (i32, i32) {
    %c0_i32 = arith.constant 0 : i32
    %c0_i32_0 = arith.constant 0 : i32
    %c0_i32_1 = arith.constant 0 : i32
    return %c0_i32, %c0_i32_0 : i32, i32
  }
  func.func @transform_5(%arg0: i32, %arg1: memref<2xi32, #tpu.memory_space<smem>>) -> (i32, i32) {
    %c0_i32 = arith.constant 0 : i32
    %c0_i32_0 = arith.constant 0 : i32
    %c0_i32_1 = arith.constant 0 : i32
    return %c0_i32, %c0_i32_0 : i32, i32
  }
  func.func @transform_6(%arg0: i32, %arg1: memref<2xi32, #tpu.memory_space<smem>>) -> (i32, i32, i32) {
    %c0_i32 = arith.constant 0 : i32
    %c0_i32_0 = arith.constant 0 : i32
    %c0_i32_1 = arith.constant 0 : i32
    return %arg0, %c0_i32, %c0_i32_0 : i32, i32, i32
  }
  func.func @transform_7(%arg0: i32, %arg1: memref<2xi32, #tpu.memory_space<smem>>) -> (i32, i32, i32) {
    %c0_i32 = arith.constant 0 : i32
    %c0_i32_0 = arith.constant 0 : i32
    %c0_i32_1 = arith.constant 0 : i32
    return %arg0, %c0_i32, %c0_i32_0 : i32, i32, i32
  }
}

</mosaic_0001>

<bundles_post_ra>
// kernel: additive_attention.1
= control target key start
LH: loop header
LB: loop body
LE: loop exit
PB: predicated region body
PF: predicated region fallthrough
CT: control target
= control target key end

     0   :  { %s1542_s0 = inlined_call_operand.vmem [shape: s32[2], index: 0, kind: input, shape index: {}]   ;;  %s1543_s1 = inlined_call_operand.vmem [shape: f32[20,8], index: 1, kind: input, shape index: {}]   ;;  %s1544_s2 = inlined_call_operand.vmem [shape: f32[16,16], index: 2, kind: input, shape index: {}]   ;;  %s1545_s3 = inlined_call_operand.vmem [shape: f32[2,8,4], index: 3, kind: input, shape index: {}]   ;;  %s1546_s4 = inlined_call_operand.vmem [shape: f32[32,20], index: 4, kind: input, shape index: {}]   ;;  %s1547_s5 = inlined_call_operand.vmem [shape: f32[32,16], index: 5, kind: input, shape index: {}]   ;;  %s1548_s6 = inlined_call_operand.vmem [shape: f32[32,1], index: 6, kind: input, shape index: {}]   ;;  %s1549_s7 = inlined_call_operand.hbm [shape: f32[2,4,4], index: 7, kind: output, shape index: {0}]   ;;  %s1550_s8 = inlined_call_operand.hbm [shape: f32[2,4,8], index: 8, kind: output, shape index: {1}]  }
   0x1   :  { %s14_s29 = sshll.u32 %s1542_s0, 4  ;;  %s15_s29 = int_to_ptr.vmem [resolvable:$true] %s14_s29 }
   0x2   :  { %s1159_s30 = scalar_lea.vmem %s15_s29, 16  ;;  %p1164_p1 = scmp.lt.s32.totalorder %s15_s29, %s15_s29 }
   0x3   :  { %p1160_p0 = scmp.ne.s32.totalorder %s15_s29, %s1159_s30  ;;  %p1165_p2 = scmp.lt.s32.totalorder %s1159_s30, %s1159_s30 }
   0x5   :  { %p1166_p3 = por %p1165_p2, %p1164_p1 }
   0x7   :  { %p1167_p4 = pnand %p1166_p3, %p1160_p0 }
   0x9   :  { %1170 = shalt.err (!%p1167_p4)  }
   0xa   :  { %s1221_s9 = smov [#allocation5]  }
   0xb   :  { %17 = dma.vmem_to_smem %s15_s29, 16, %s1221_s9, [#allocation4] }
   0xc   :  { %1215 = dma.done.wait [#allocation4], 16 }
   0xd   :  { %1216 = vsyncadd [#allocation4], 4294967280 }
   0xe   :  { %19 = sfence }
   0xf   :  { %20 = vsyncpa [#allocation7], 0  ;;  %v38_v0 = vld [vmem:[%s1543_s1] sm:$0xff]  ;;  %v39_v1 = vld [vmem:[%s1543_s1 + $0x8] sm:$0xff]  ;;  %vm41_vm0 = vcmask 162816   ;;  %vm54_vm1 = vcmask 1043456  }
  0x10   :  { %v1067_v2 = vpack.c.bf16 %v39_v1, %v38_v0  ;;  %v34_v3 = vld [vmem:[%s1546_s4] sm:$0xff]  ;;  %v40_v4 = vld [vmem:[%s1543_s1 + $0x10] sm:$0xf]  ;;  %v1222_v5 = vmov 0  }
  0x11   :  { %1041 = vmatprep.mubr.msk.f32.mxu0 %vm41_vm0, %v34_v3  ;;  %1085 = vset.pattern.permute.xlu1 %v1222_v5  ;;  %v1295_v6 = vld [vmem:[%s1548_s6] sm:$0xff] }
  0x12   :  { %1068 = vmatprep.subr.bf16.mxu0 %v1067_v2  ;;  %777 = vperm.xlu1 %1085, %v1295_v6  }
  0x13   :  { %21 = vsyncpa [#allocation9], 0  ;;  %1070 = vmatpush3.bf16.msra.mxu0 %v1067_v2  ;;  %v1301_v7 = vld [vmem:[%s1548_s6 + $0x8] sm:$0xff]  ;;  %v36_v9 = vld [vmem:[%s1546_s4 + $0x10] sm:$0xff]  ;;  %vm143_vm2 = vcmask 64512   ;;  %vm154_vm3 = vcmask 130048   ;;  %v256_v37 = vlaneseq }
  0x14   :  { %1039 = vmatprep.subr.msk.mxu0 %vm54_vm1, %v40_v4  ;;  %v35_v8 = vld [vmem:[%s1546_s4 + $0x8] sm:$0xff]  ;;  %v37_v10 = vld [vmem:[%s1546_s4 + $0x18] sm:$0xff]  ;;  %v152_v16 = vld [vmem:[%s1544_s2] sm:$0xff]  ;;  %s1223_s29 = smov 124   ;;  %vm811_vm4 = vcmask 130112   ;;  %vm510_vm5 = vcmask 1041409  }
  0x15   :  { %v153_v17 = vld [vmem:[%s1544_s2 + $0x8] sm:$0xff]  ;;  %v148_v19 = vld [vmem:[%s1547_s5] sm:$0xff]  ;;  %v1343_v24 = vld [vmem:[%s1548_s6 + $0x10] sm:$0xff]  ;;  %v1368_v38 = vshrl.u32 %v256_v37, 7  ;;  %vm512_vm6 = vcmask 1042434   ;;  %vm514_vm7 = vcmask 1043459  }
  0x16   :  { %782 = vperm.xlu1 %1085, %v1301_v7   ;;  %v1071_v18 = vpack.c.bf16 %v153_v17, %v152_v16  ;;  %1051 = vmatprep.mubr.msk.f32.mxu1 %vm154_vm3, %v148_v19  ;;  %v149_v22 = vld [vmem:[%s1547_s5 + $0x8] sm:$0xff]  ;;  %v150_v25 = vld [vmem:[%s1547_s5 + $0x10] sm:$0xff]  ;;  %v151_v26 = vld [vmem:[%s1547_s5 + $0x18] sm:$0xff]  ;;  %s1224_s5 = smov 120   ;;  %vm518_vm9 = vcmask 60416   ;;  %s503_s18 = sld [smem:[#allocation5]] }
  0x17   :  { %1040 = vmatpush3.msk.msra.mxu0 %vm54_vm1, %v40_v4  ;;  %v1356_v27 = vld [vmem:[%s1548_s6 + $0x18] sm:$0xff]  ;;  %v304_v39 = vsub.s32 0, %v1368_v38  ;;  %v323_v42 = vsub.s32 1, %v1368_v38  ;;  %v342_v45 = vsub.s32 2, %v1368_v38  ;;  %v361_v47 = vsub.s32 3, %v1368_v38  ;;  %s1015_s6 = sld [smem:[#allocation5 + $0x1]] }
  0x18   :  { %1042 = vmatmul.mubr.msk.f32.vlgmr.msra.gmra.mrb[0].mxu0 %vm41_vm0, %v35_v8  ;;  %1072 = vmatprep.subr.bf16.mxu1 %v1071_v18  ;;  %vm1226_vm11 = vmmov 0   ;;  %s1227_s22 = smov [#allocation8]  }
  0x19   :  { %1044 = vmatprep.mubr.msk.f32.mxu0 %vm41_vm0, %v36_v9  ;;  %1074 = vmatpush3.bf16.msra.mxu1 %v1071_v18  ;;  %s990_s23 = sshll.u32 %s1227_s22, 4  ;;  %s991_s23 = int_to_ptr.vmem [resolvable:$true] %s990_s23 }
  0x1a   :  { %p1176_p6 = scmp.lt.s32.totalorder %s991_s23, %s991_s23 }
  0x1c   :  { %1045 = vmatmul.mubr.msk.f32.gmra.mrb[2].mxu0 %vm41_vm0, %v37_v10  ;;  %1052 = vmatmul.mubr.msk.f32.vlgmr.msra.gmra.mrb[0].mxu1 %vm154_vm3, %v149_v22 }
  0x1d   :  { %1054 = vmatprep.mubr.msk.f32.mxu1 %vm154_vm3, %v150_v25  ;;  %v870_v38 = vstv %s1015_s6 }
  0x20   :  { %1055 = vmatmul.mubr.msk.f32.gmra.mrb[2].mxu1 %vm154_vm3, %v151_v26 }
  0x91   :  { %v1360_v28 = vpop.permute.xlu1 %777 }
  0x95   :  { %v1362_v29 = vpop.permute.xlu1 %782 }
  0xeb   :  { %v1043_v11 = vpop.f32.mrb[0].mxu0 }
  0xec   :  { %145 = vst.msk [vmem:[#allocation2 + $0x8] sm:$0xff] %vm143_vm2, %v1043_v11  ;;  %v124_v12 = vpop.f32.mrb[1].mxu0 }
  0xed   :  { %144 = vst.msk [vmem:[#allocation2] sm:$0xff] %vm143_vm2, %v124_v12 }
  0xef   :  { %v1046_v13 = vpop.f32.mrb[2].mxu0  ;;  %v1053_v34 = vpop.f32.mrb[0].mxu1 }
  0xf0   :  { %147 = vst.msk [vmem:[#allocation2 + $0x18] sm:$0xff] %vm143_vm2, %v1046_v13  ;;  %v134_v14 = vpop.f32.mrb[3].mxu0  ;;  %v233_v35 = vpop.f32.mrb[1].mxu1 }
  0xf1   :  { %146 = vst.msk [vmem:[#allocation2 + $0x10] sm:$0xff] %vm143_vm2, %v134_v14 }
  0xf2   :  { %253 = vst.msk [vmem:[#allocation3 + $0x8] sm:$0xff] %vm154_vm3, %v1053_v34  ;;  %252 = vst.msk [vmem:[#allocation3] sm:$0xff] %vm154_vm3, %v233_v35 }
  0xf3   :  { %v608_v21 = vld [vmem:[#allocation2 + $0x8] sm:$0xff]  ;;  %v1056_v36 = vpop.f32.mrb[2].mxu1 }
  0xf4   :  { %v1320_v15 = vld [vmem:[#allocation2] sm:$0xff]  ;;  %255 = vst.msk [vmem:[#allocation3 + $0x18] sm:$0xff] %vm154_vm3, %v1056_v36  ;;  %v243_v43 = vpop.f32.mrb[3].mxu1 }
  0xf5   :  { %623 = vrot.lane.b32.xlu0 %v1320_v15, %s1223_s29  ;;  %254 = vst.msk [vmem:[#allocation3 + $0x10] sm:$0xff] %vm154_vm3, %v243_v43 }
  0xf7   :  { %v1333_v20 = vld [vmem:[#allocation2 + $0x18] sm:$0xff] }
  0xf8   :  { %629 = vrot.lane.b32.xlu1 %v1333_v20, %s1223_s29  ;;  %v609_v23 = vld [vmem:[#allocation2 + $0x10] sm:$0xff] }
  0xf9   :  { %625 = vrot.lane.b32.xlu0 %v608_v21, %s1223_s29  ;;  %v1391_v1 = vld [vmem:[#allocation3] sm:$0xff]  ;;  %v1393_v2 = vld [vmem:[#allocation3 + $0x8] sm:$0xff] }
  0xfb   :  { %v1389_v63 = vld [vmem:[#allocation3 + $0x18] sm:$0xff] }
  0xfc   :  { %627 = vrot.lane.b32.xlu1 %v609_v23, %s1223_s29  ;;  %v1400_v11 = vld [vmem:[#allocation3 + $0x10] sm:$0xff] }
 0x100   :  { %787 = vperm.xlu1 %1085, %v1343_v24  }
 0x104   :  { %792 = vperm.xlu1 %1085, %v1356_v27  }
 0x167   :  { %v624_v30 = vpop.permute.xlu0 %623 }
 0x168   :  { %635 = vxpose.xlu0.b32.start [1/4] (short) (narrow) %v624_v30, 8 }
 0x16a   :  { %v630_v31 = vpop.permute.xlu1 %629 }
 0x16b   :  { %v626_v32 = vpop.permute.xlu0 %625 }
 0x16c   :  { %636 = vxpose.xlu0.b32.cont [2/4] (short) (narrow) %v626_v32, 8 }
 0x16e   :  { %v628_v33 = vpop.permute.xlu1 %627 }
 0x170   :  { %637 = vxpose.xlu0.b32.cont [3/4] (short) (narrow) %v628_v33, 8 }
 0x174   :  { %638 = vxpose.xlu0.b32.end [4/4] (short) (narrow) %v630_v31, 8 }
 0x17f   :  { %v1384_v49 = vpop.permute.xlu1 %787 }
 0x183   :  { %v1387_v50 = vpop.permute.xlu1 %792 }
 0x19d   :  { %1086 = vset.pattern.permute.xlu0 %v1222_v5 }
 0x1e8   :  { %v651_v40 = vpop.trf.xlu0 }
 0x1e9   :  { %v670_v41 = vrot.slane %v651_v40, %v304_v39  ;;  %v689_v44 = vrot.slane %v651_v40, %v323_v42  ;;  %v708_v46 = vrot.slane %v651_v40, %v342_v45  ;;  %v727_v48 = vrot.slane %v651_v40, %v361_v47 }
 0x1eb   :  { %684 = vbcast.lane.b32.xlu0 %v670_v41, 280  ;;  %672 = vbcast.lane.b32.xlu1 %v670_v41, 256 }
 0x1ef   :  { %676 = vbcast.lane.b32.xlu1 %v670_v41, 264 }
 0x1f3   :  { %691 = vbcast.lane.b32.xlu1 %v689_v44, 256 }
 0x1f7   :  { %695 = vbcast.lane.b32.xlu1 %v689_v44, 264 }
 0x1fb   :  { %710 = vbcast.lane.b32.xlu1 %v708_v46, 256 }
 0x1ff   :  { %714 = vbcast.lane.b32.xlu1 %v708_v46, 264 }
 0x203   :  { %680 = vbcast.lane.b32.xlu1 %v670_v41, 272 }
 0x207   :  { %699 = vbcast.lane.b32.xlu1 %v689_v44, 272 }
 0x20b   :  { %729 = vbcast.lane.b32.xlu1 %v727_v48, 256 }
 0x20f   :  { %733 = vbcast.lane.b32.xlu1 %v727_v48, 264 }
 0x213   :  { %718 = vbcast.lane.b32.xlu1 %v708_v46, 272 }
 0x217   :  { %703 = vbcast.lane.b32.xlu1 %v689_v44, 280 }
 0x21b   :  { %737 = vbcast.lane.b32.xlu1 %v727_v48, 272 }
 0x21f   :  { %722 = vbcast.lane.b32.xlu1 %v708_v46, 280 }
 0x223   :  { %741 = vbcast.lane.b32.xlu1 %v727_v48, 280 }
 0x24c   :  { %270 = vxpose.xlu1.b32.start [1/4] (short) (narrow) %v1320_v15, 8 }
 0x250   :  { %271 = vxpose.xlu1.b32.cont [2/4] (short) (narrow) %v608_v21, 8 }
 0x254   :  { %272 = vxpose.xlu1.b32.cont [3/4] (short) (narrow) %v609_v23, 8 }
 0x258   :  { %273 = vxpose.xlu1.b32.end [4/4] (short) (narrow) %v1333_v20, 8 }
 0x25d   :  { %v673_v51 = vpop.permute.xlu1 %672  ;;  %v685_v0 = vpop.permute.xlu0 %684 }
 0x25e   :  { %v746_v3 = vadd.f32 %v685_v0, %v1389_v63  ;;  %v743_v5 = vadd.f32 %v673_v51, %v1391_v1 }
 0x260   :  { %1087 = vtanh.f32 %v746_v3 }
 0x261   :  { %v677_v52 = vpop.permute.xlu1 %676  ;;  %1089 = vtanh.f32 %v743_v5 }
 0x262   :  { %v744_v8 = vadd.f32 %v677_v52, %v1393_v2 }
 0x264   :  { %1091 = vtanh.f32 %v744_v8 }
 0x265   :  { %v692_v53 = vpop.permute.xlu1 %691 }
 0x266   :  { %v747_v9 = vadd.f32 %v692_v53, %v1391_v1 }
 0x268   :  { %1093 = vtanh.f32 %v747_v9 }
 0x269   :  { %v696_v54 = vpop.permute.xlu1 %695 }
 0x26a   :  { %v748_v10 = vadd.f32 %v696_v54, %v1393_v2  ;;  %v1088_v23 = vpop.eup %1087 }
 0x26b   :  { %v1090_v26 = vpop.eup %1089 }
 0x26c   :  { %1095 = vtanh.f32 %v748_v10  ;;  %v795_v53 = vmul.f32 %v1090_v26, %v1360_v28 }
 0x26d   :  { %v711_v55 = vpop.permute.xlu1 %710 }
 0x26e   :  { %v751_v12 = vadd.f32 %v711_v55, %v1391_v1  ;;  %v1092_v31 = vpop.eup %1091  ;;  %v812_v10 = vsel %vm811_vm4, %v795_v53, 0.0 }
 0x26f   :  { %v796_v46 = vmul.f32 %v1092_v31, %v1362_v29 }
 0x270   :  { %1097 = vtanh.f32 %v751_v12 }
 0x271   :  { %v715_v56 = vpop.permute.xlu1 %714 }
 0x272   :  { %v752_v13 = vadd.f32 %v715_v56, %v1393_v2  ;;  %v1094_v32 = vpop.eup %1093 }
 0x273   :  { %v799_v54 = vmul.f32 %v1094_v32, %v1360_v28 }
 0x274   :  { %1099 = vtanh.f32 %v752_v13 }
 0x275   :  { %v681_v57 = vpop.permute.xlu1 %680 }
 0x276   :  { %v745_v15 = vadd.f32 %v681_v57, %v1400_v11  ;;  %v1096_v33 = vpop.eup %1095 }
 0x277   :  { %v800_v51 = vmul.f32 %v1096_v33, %v1362_v29 }
 0x278   :  { %1101 = vtanh.f32 %v745_v15 }
 0x279   :  { %v700_v58 = vpop.permute.xlu1 %699 }
 0x27a   :  { %v749_v16 = vadd.f32 %v700_v58, %v1400_v11  ;;  %v1098_v34 = vpop.eup %1097 }
 0x27b   :  { %v803_v0 = vmul.f32 %v1098_v34, %v1360_v28 }
 0x27c   :  { %1103 = vtanh.f32 %v749_v16 }
 0x27d   :  { %v730_v59 = vpop.permute.xlu1 %729 }
 0x27e   :  { %v755_v17 = vadd.f32 %v730_v59, %v1391_v1  ;;  %v1100_v35 = vpop.eup %1099 }
 0x27f   :  { %v804_v55 = vmul.f32 %v1100_v35, %v1362_v29 }
 0x280   :  { %1105 = vtanh.f32 %v755_v17 }
 0x281   :  { %v734_v60 = vpop.permute.xlu1 %733  ;;  %v839_v12 = vsel %vm811_vm4, %v804_v55, 0.0 }
 0x282   :  { %v756_v18 = vadd.f32 %v734_v60, %v1393_v2  ;;  %v1102_v36 = vpop.eup %1101 }
 0x283   :  { %v797_v57 = vmul.f32 %v1102_v36, %v1384_v49 }
 0x284   :  { %1107 = vtanh.f32 %v756_v18 }
 0x285   :  { %v719_v61 = vpop.permute.xlu1 %718 }
 0x286   :  { %v753_v19 = vadd.f32 %v719_v61, %v1400_v11  ;;  %v1104_v40 = vpop.eup %1103  ;;  %v798_v61 = vmul.f32 %v1088_v23, %v1387_v50 }
 0x287   :  { %v801_v58 = vmul.f32 %v1104_v40, %v1384_v49 }
 0x288   :  { %1109 = vtanh.f32 %v753_v19  ;;  %v817_v35 = vsel %vm811_vm4, %v798_v61, 0.0 }
 0x289   :  { %v704_v62 = vpop.permute.xlu1 %703  ;;  %v828_v15 = vsel %vm811_vm4, %v801_v58, 0.0 }
 0x28a   :  { %v750_v20 = vadd.f32 %v704_v62, %v1389_v63  ;;  %v1106_v41 = vpop.eup %1105  ;;  %v813_v62 = vsel %vm811_vm4, %v796_v46, 0.0 }
 0x28b   :  { %v807_v5 = vmul.f32 %v1106_v41, %v1360_v28  ;;  %v814_v17 = vadd.f32 %v813_v62, %v812_v10 }
 0x28c   :  { %1111 = vtanh.f32 %v750_v20 }
 0x28d   :  { %v738_v4 = vpop.permute.xlu1 %737 }
 0x28e   :  { %v757_v22 = vadd.f32 %v738_v4, %v1400_v11  ;;  %v1108_v43 = vpop.eup %1107  ;;  %v826_v4 = vsel %vm811_vm4, %v800_v51, 0.0 }
 0x28f   :  { %v808_v59 = vmul.f32 %v1108_v43, %v1362_v29  ;;  %v825_v29 = vsel %vm811_vm4, %v799_v54, 0.0 }
 0x290   :  { %1113 = vtanh.f32 %v757_v22  ;;  %v827_v18 = vadd.f32 %v826_v4, %v825_v29 }
 0x291   :  { %v723_v14 = vpop.permute.xlu1 %722  ;;  %v852_v16 = vsel %vm811_vm4, %v808_v59, 0.0 }
 0x292   :  { %v754_v25 = vadd.f32 %v723_v14, %v1389_v63  ;;  %v1110_v44 = vpop.eup %1109  ;;  %v815_v14 = vsel %vm811_vm4, %v797_v57, 0.0  ;;  %v829_v26 = vadd.f32 %v828_v15, %v827_v18 }
 0x293   :  { %v805_v3 = vmul.f32 %v1110_v44, %v1384_v49 }
 0x294   :  { %1115 = vtanh.f32 %v754_v25  ;;  %v816_v25 = vadd.f32 %v815_v14, %v814_v17 }
 0x295   :  { %v742_v21 = vpop.permute.xlu1 %741  ;;  %v841_v19 = vsel %vm811_vm4, %v805_v3, 0.0 }
 0x296   :  { %v758_v30 = vadd.f32 %v742_v21, %v1389_v63  ;;  %v1112_v48 = vpop.eup %1111  ;;  %v851_v21 = vsel %vm811_vm4, %v807_v5, 0.0  ;;  %v818_v40 = vadd.f32 %v817_v35, %v816_v25 }
 0x297   :  { %v802_v8 = vmul.f32 %v1112_v48, %v1387_v50 }
 0x298   :  { %1117 = vtanh.f32 %v758_v30  ;;  %v853_v30 = vadd.f32 %v852_v16, %v851_v21  ;;  %v819_v46 = vrot.slane %v818_v40, 4 }
 0x299   :  { %v830_v22 = vsel %vm811_vm4, %v802_v8, 0.0 }
 0x29a   :  { %v1114_v52 = vpop.eup %1113  ;;  %v831_v33 = vadd.f32 %v830_v22, %v829_v26  ;;  %v820_v53 = vadd.f32 %v819_v46, %v818_v40 }
 0x29b   :  { %v809_v9 = vmul.f32 %v1114_v52, %v1384_v49  ;;  %v838_v49 = vsel %vm811_vm4, %v803_v0, 0.0 }
 0x29c   :  { %v840_v20 = vadd.f32 %v839_v12, %v838_v49  ;;  %v832_v43 = vrot.slane %v831_v33, 4  ;;  %v821_v57 = vrot.slane %v820_v53, 2 }
 0x29d   :  { %v854_v23 = vsel %vm811_vm4, %v809_v9, 0.0 }
 0x29e   :  { %v1116_v56 = vpop.eup %1115  ;;  %v842_v32 = vadd.f32 %v841_v19, %v840_v20  ;;  %v855_v34 = vadd.f32 %v854_v23, %v853_v30  ;;  %v833_v51 = vadd.f32 %v832_v43, %v831_v33  ;;  %v822_v62 = vadd.f32 %v821_v57, %v820_v53 }
 0x29f   :  { %v806_v13 = vmul.f32 %v1116_v56, %v1387_v50 }
 0x2a0   :  { %v834_v55 = vrot.slane %v833_v51, 2  ;;  %v823_v4 = vrot.slane %v822_v62, 1 }
 0x2a1   :  { %v843_v31 = vsel %vm811_vm4, %v806_v13, 0.0 }
 0x2a2   :  { %v1118_v60 = vpop.eup %1117  ;;  %v844_v36 = vadd.f32 %v843_v31, %v842_v32  ;;  %v835_v59 = vadd.f32 %v834_v55, %v833_v51  ;;  %v824_v13 = vadd.f32 %v823_v4, %v822_v62 }
 0x2a3   :  { %v810_v28 = vmul.f32 %v1118_v60, %v1387_v50 }
 0x2a4   :  { %v845_v44 = vrot.slane %v844_v36, 4  ;;  %v836_v61 = vrot.slane %v835_v59, 1 }
 0x2a5   :  { %v856_v50 = vsel %vm811_vm4, %v810_v28, 0.0 }
 0x2a6   :  { %v857_v41 = vadd.f32 %v856_v50, %v855_v34  ;;  %v846_v52 = vadd.f32 %v845_v44, %v844_v36  ;;  %v837_v9 = vadd.f32 %v836_v61, %v835_v59 }
 0x2a8   :  { %v858_v48 = vrot.slane %v857_v41, 4  ;;  %v847_v56 = vrot.slane %v846_v52, 2  ;;  %v876_v15 = vsel %vm510_vm5, %v837_v9, %v824_v13 }
 0x2aa   :  { %v859_v54 = vadd.f32 %v858_v48, %v857_v41  ;;  %v848_v60 = vadd.f32 %v847_v56, %v846_v52 }
 0x2ac   :  { %v860_v58 = vrot.slane %v859_v54, 2  ;;  %v849_v3 = vrot.slane %v848_v60, 1 }
 0x2ae   :  { %v861_v0 = vadd.f32 %v860_v58, %v859_v54  ;;  %v850_v12 = vadd.f32 %v849_v3, %v848_v60 }
 0x2b0   :  { %v862_v5 = vrot.slane %v861_v0, 1  ;;  %v877_v16 = vsel %vm512_vm6, %v850_v12, %v876_v15 }
 0x2b2   :  { %v863_v14 = vadd.f32 %v862_v5, %v861_v0 }
 0x2b4   :  { %v878_v28 = vsel %vm514_vm7, %v863_v14, %v877_v16 }
 0x2cc   :  { %v286_v8 = vpop.trf.xlu1 }
 0x2cd   :  { %v305_v10 = vrot.slane %v286_v8, %v304_v39  ;;  %v324_v29 = vrot.slane %v286_v8, %v323_v42  ;;  %v343_v39 = vrot.slane %v286_v8, %v342_v45  ;;  %v362_v42 = vrot.slane %v286_v8, %v361_v47 }
 0x2ce   :  { %v1461_v45 = vand.u32 127, %v256_v37 }
 0x2cf   :  { %338 = vbcast.lane.b32.xlu1 %v324_v29, 280  ;;  %307 = vbcast.lane.b32.xlu0 %v305_v10, 256 }
 0x2d0   :  { %vm871_vm8 = vcmp.lt.s32.totalorder %v1461_v45, %v870_v38 }
 0x2d3   :  { %879 = vrot.lane.b32.xlu1 %v878_v28, %s1224_s5  ;;  %311 = vbcast.lane.b32.xlu0 %v305_v10, 264 }
 0x2d7   :  { %326 = vbcast.lane.b32.xlu0 %v324_v29, 256 }
 0x2db   :  { %330 = vbcast.lane.b32.xlu0 %v324_v29, 264 }
 0x2df   :  { %345 = vbcast.lane.b32.xlu0 %v343_v39, 256 }
 0x2e3   :  { %349 = vbcast.lane.b32.xlu0 %v343_v39, 264 }
 0x2e7   :  { %315 = vbcast.lane.b32.xlu0 %v305_v10, 272 }
 0x2eb   :  { %334 = vbcast.lane.b32.xlu0 %v324_v29, 272 }
 0x2ef   :  { %364 = vbcast.lane.b32.xlu0 %v362_v42, 256 }
 0x2f3   :  { %368 = vbcast.lane.b32.xlu0 %v362_v42, 264 }
 0x2f7   :  { %353 = vbcast.lane.b32.xlu0 %v343_v39, 272 }
 0x2fb   :  { %319 = vbcast.lane.b32.xlu0 %v305_v10, 280 }
 0x2ff   :  { %372 = vbcast.lane.b32.xlu0 %v362_v42, 272 }
 0x303   :  { %357 = vbcast.lane.b32.xlu0 %v343_v39, 280 }
 0x307   :  { %376 = vbcast.lane.b32.xlu0 %v362_v42, 280 }
 0x30b   :  { %412 = vperm.xlu0 %1086, %v1295_v6  }
 0x30f   :  { %417 = vperm.xlu0 %1086, %v1301_v7  }
 0x313   :  { %422 = vperm.xlu0 %1086, %v1343_v24  }
 0x317   :  { %427 = vperm.xlu0 %1086, %v1356_v27  }
 0x341   :  { %v339_v47 = vpop.permute.xlu1 %338  ;;  %v308_v17 = vpop.permute.xlu0 %307 }
 0x342   :  { %v378_v30 = vadd.f32 %v1391_v1, %v308_v17  ;;  %v385_v51 = vadd.f32 %v1389_v63, %v339_v47 }
 0x344   :  { %1119 = vtanh.f32 %v378_v30 }
 0x345   :  { %v880_v18 = vpop.permute.xlu1 %879  ;;  %v312_v49 = vpop.permute.xlu0 %311 }
 0x346   :  { %v1464_v19 = vsel %vm871_vm8, %v880_v18, -1000000.0  ;;  %v379_v32 = vadd.f32 %v1393_v2, %v312_v49 }
 0x347   :  { %v883_v6 = vsel %vm518_vm9, %v1464_v19, -inf }
 0x348   :  { %884 = vmax.xlane.f32.xlu1 %v883_v6  ;;  %1121 = vtanh.f32 %v379_v32 }
 0x349   :  { %v327_v7 = vpop.permute.xlu0 %326 }
 0x34a   :  { %v382_v50 = vadd.f32 %v1391_v1, %v327_v7 }
 0x34c   :  { %1123 = vtanh.f32 %v382_v50 }
 0x34d   :  { %v331_v24 = vpop.permute.xlu0 %330 }
 0x34e   :  { %v383_v33 = vadd.f32 %v1393_v2, %v331_v24 }
 0x350   :  { %1125 = vtanh.f32 %v383_v33 }
 0x351   :  { %v346_v27 = vpop.permute.xlu0 %345 }
 0x352   :  { %v386_v34 = vadd.f32 %v1391_v1, %v346_v27 }
 0x354   :  { %1127 = vtanh.f32 %v386_v34 }
 0x355   :  { %v350_v20 = vpop.permute.xlu0 %349 }
 0x356   :  { %v387_v35 = vadd.f32 %v1393_v2, %v350_v20 }
 0x358   :  { %1129 = vtanh.f32 %v387_v35 }
 0x359   :  { %v316_v37 = vpop.permute.xlu0 %315 }
 0x35a   :  { %v380_v36 = vadd.f32 %v1400_v11, %v316_v37 }
 0x35c   :  { %1131 = vtanh.f32 %v380_v36 }
 0x35d   :  { %v335_v21 = vpop.permute.xlu0 %334 }
 0x35e   :  { %v384_v44 = vadd.f32 %v1400_v11, %v335_v21 }
 0x361   :  { %v365_v22 = vpop.permute.xlu0 %364 }
 0x362   :  { %v390_v43 = vadd.f32 %v1391_v1, %v365_v22 }
 0x365   :  { %v369_v23 = vpop.permute.xlu0 %368 }
 0x366   :  { %v391_v41 = vadd.f32 %v1393_v2, %v369_v23  ;;  %v1120_v2 = vpop.eup %1119 }
 0x367   :  { %v1122_v54 = vpop.eup %1121 }
 0x368   :  { %1133 = vtanh.f32 %v391_v41  ;;  %v1124_v56 = vpop.eup %1123 }
 0x369   :  { %v354_v25 = vpop.permute.xlu0 %353  ;;  %1135 = vtanh.f32 %v390_v43  ;;  %v1126_v57 = vpop.eup %1125 }
 0x36a   :  { %v388_v46 = vadd.f32 %v1400_v11, %v354_v25  ;;  %1137 = vtanh.f32 %v384_v44  ;;  %v1128_v58 = vpop.eup %1127 }
 0x36b   :  { %v1130_v59 = vpop.eup %1129 }
 0x36c   :  { %1139 = vtanh.f32 %v388_v46  ;;  %v1132_v60 = vpop.eup %1131 }
 0x36d   :  { %v320_v26 = vpop.permute.xlu0 %319 }
 0x36e   :  { %v381_v53 = vadd.f32 %v1389_v63, %v320_v26 }
 0x371   :  { %v373_v31 = vpop.permute.xlu0 %372 }
 0x372   :  { %v392_v48 = vadd.f32 %v1400_v11, %v373_v31  ;;  %v1134_v62 = vpop.eup %1133 }
 0x373   :  { %v1136_v61 = vpop.eup %1135 }
 0x374   :  { %1141 = vtanh.f32 %v392_v48  ;;  %v1138_v9 = vpop.eup %1137 }
 0x375   :  { %v358_v40 = vpop.permute.xlu0 %357  ;;  %1143 = vtanh.f32 %v385_v51 }
 0x376   :  { %v389_v1 = vadd.f32 %v1389_v63, %v358_v40  ;;  %1145 = vtanh.f32 %v381_v53  ;;  %v1140_v13 = vpop.eup %1139 }
 0x378   :  { %1147 = vtanh.f32 %v389_v1 }
 0x379   :  { %v377_v52 = vpop.permute.xlu0 %376 }
 0x37a   :  { %v393_v55 = vadd.f32 %v1389_v63, %v377_v52 }
 0x37c   :  { %1149 = vtanh.f32 %v393_v55 }
 0x37e   :  { %v1142_v14 = vpop.eup %1141 }
 0x37f   :  { %v1144_v38 = vpop.eup %1143 }
 0x380   :  { %v1146_v6 = vpop.eup %1145 }
 0x382   :  { %v1148_v37 = vpop.eup %1147 }
 0x386   :  { %v1150_v26 = vpop.eup %1149 }
 0x38a   :  { %v413_v11 = vpop.permute.xlu0 %412 }
 0x38b   :  { %v430_v10 = vmul.f32 %v1120_v2, %v413_v11  ;;  %v434_v63 = vmul.f32 %v1124_v56, %v413_v11  ;;  %v438_v29 = vmul.f32 %v1128_v58, %v413_v11  ;;  %v442_v12 = vmul.f32 %v1136_v61, %v413_v11 }
 0x38d   :  { %v446_v7 = vsel %vm143_vm2, %v430_v10, 0.0  ;;  %v459_v24 = vsel %vm143_vm2, %v434_v63, 0.0  ;;  %v472_v27 = vsel %vm143_vm2, %v438_v29, 0.0  ;;  %v485_v20 = vsel %vm143_vm2, %v442_v12, 0.0 }
 0x38e   :  { %v418_v0 = vpop.permute.xlu0 %417 }
 0x38f   :  { %v431_v3 = vmul.f32 %v1122_v54, %v418_v0  ;;  %v435_v4 = vmul.f32 %v1126_v57, %v418_v0  ;;  %v439_v5 = vmul.f32 %v1130_v59, %v418_v0  ;;  %v443_v8 = vmul.f32 %v1134_v62, %v418_v0 }
 0x391   :  { %v447_v15 = vsel %vm143_vm2, %v431_v3, 0.0  ;;  %v460_v16 = vsel %vm143_vm2, %v435_v4, 0.0  ;;  %v473_v28 = vsel %vm143_vm2, %v439_v5, 0.0  ;;  %v486_v39 = vsel %vm143_vm2, %v443_v8, 0.0 }
 0x392   :  { %v423_v42 = vpop.permute.xlu0 %422  ;;  %v448_v30 = vadd.f32 %v447_v15, %v446_v7  ;;  %v461_v31 = vadd.f32 %v460_v16, %v459_v24  ;;  %v474_v32 = vadd.f32 %v473_v28, %v472_v27  ;;  %v487_v50 = vadd.f32 %v486_v39, %v485_v20 }
 0x393   :  { %v432_v47 = vmul.f32 %v1132_v60, %v423_v42  ;;  %v436_v17 = vmul.f32 %v1138_v9, %v423_v42  ;;  %v440_v18 = vmul.f32 %v1140_v13, %v423_v42  ;;  %v444_v49 = vmul.f32 %v1142_v14, %v423_v42 }
 0x394   :  { %v504_v15 = vstv %s503_s18 }
 0x395   :  { %v449_v21 = vsel %vm143_vm2, %v432_v47, 0.0  ;;  %v462_v22 = vsel %vm143_vm2, %v436_v17, 0.0  ;;  %v475_v23 = vsel %vm143_vm2, %v440_v18, 0.0  ;;  %v488_v25 = vsel %vm143_vm2, %v444_v49, 0.0 }
 0x396   :  { %v428_v33 = vpop.permute.xlu0 %427  ;;  %v450_v41 = vadd.f32 %v449_v21, %v448_v30  ;;  %v463_v43 = vadd.f32 %v462_v22, %v461_v31  ;;  %v476_v44 = vadd.f32 %v475_v23, %v474_v32  ;;  %v489_v46 = vadd.f32 %v488_v25, %v487_v50 }
 0x397   :  { %v433_v34 = vmul.f32 %v1146_v6, %v428_v33  ;;  %v437_v35 = vmul.f32 %v1144_v38, %v428_v33  ;;  %v441_v36 = vmul.f32 %v1148_v37, %v428_v33  ;;  %v445_v40 = vmul.f32 %v1150_v26, %v428_v33  ;;  %v1016_v26 = vld [vmem:[%s1545_s3 + $0x8] sm:$0xff] }
 0x398   :  { %vm505_vm10 = vcmp.lt.s32.totalorder %v1461_v45, %v504_v15  ;;  %v1225_v25 = vmov 0.0  }
 0x399   :  { %v451_v48 = vsel %vm143_vm2, %v433_v34, 0.0  ;;  %v464_v51 = vsel %vm143_vm2, %v437_v35, 0.0  ;;  %v477_v52 = vsel %vm143_vm2, %v441_v36, 0.0  ;;  %v490_v53 = vsel %vm143_vm2, %v445_v40, 0.0  ;;  %1057 = vmatprep.subr.mxu1 %v1225_v25  ;;  %1062 = vmatprep.subr.mxu0 %v1225_v25 }
 0x39a   :  { %v452_v2 = vadd.f32 %v451_v48, %v450_v41  ;;  %v465_v1 = vadd.f32 %v464_v51, %v463_v43  ;;  %v478_v54 = vadd.f32 %v477_v52, %v476_v44  ;;  %v491_v55 = vadd.f32 %v490_v53, %v489_v46  ;;  %1059 = vmatprep.mubr.msk.f32.mxu1 %vm1226_vm11, %v1225_v25 }
 0x39b   :  { %1064 = vmatprep.mubr.msk.f32.mxu0 %vm1226_vm11, %v1225_v25  ;;  %1063 = vmatpush3.msra.mxu0 %v1016_v26 }
 0x39c   :  { %v453_v56 = vrot.slane %v452_v2, 4  ;;  %v466_v57 = vrot.slane %v465_v1, 4  ;;  %v479_v11 = vrot.slane %v478_v54, 4  ;;  %v492_v58 = vrot.slane %v491_v55, 4 }
 0x39e   :  { %v454_v59 = vadd.f32 %v453_v56, %v452_v2  ;;  %v467_v60 = vadd.f32 %v466_v57, %v465_v1  ;;  %v480_v62 = vadd.f32 %v479_v11, %v478_v54  ;;  %v493_v0 = vadd.f32 %v492_v58, %v491_v55 }
 0x3a0   :  { %v455_v61 = vrot.slane %v454_v59, 2  ;;  %v468_v3 = vrot.slane %v467_v60, 2  ;;  %v481_v4 = vrot.slane %v480_v62, 2  ;;  %v494_v5 = vrot.slane %v493_v0, 2 }
 0x3a2   :  { %v456_v8 = vadd.f32 %v455_v61, %v454_v59  ;;  %v469_v9 = vadd.f32 %v468_v3, %v467_v60  ;;  %v482_v10 = vadd.f32 %v481_v4, %v480_v62  ;;  %v495_v63 = vadd.f32 %v494_v5, %v493_v0 }
 0x3a4   :  { %v457_v29 = vrot.slane %v456_v8, 1  ;;  %v470_v12 = vrot.slane %v469_v9, 1  ;;  %v483_v13 = vrot.slane %v482_v10, 1  ;;  %v496_v14 = vrot.slane %v495_v63, 1 }
 0x3a6   :  { %v458_v16 = vadd.f32 %v457_v29, %v456_v8  ;;  %v471_v28 = vadd.f32 %v470_v12, %v469_v9  ;;  %v484_v39 = vadd.f32 %v483_v13, %v482_v10  ;;  %v497_v42 = vadd.f32 %v496_v14, %v495_v63 }
 0x3a8   :  { %v511_v38 = vsel %vm510_vm5, %v471_v28, %v458_v16 }
 0x3a9   :  { %v513_v47 = vsel %vm512_vm6, %v484_v39, %v511_v38 }
 0x3aa   :  { %v515_v17 = vsel %vm514_vm7, %v497_v42, %v513_v47 }
 0x3ab   :  { %v517_v18 = vsel %vm505_vm10, %v515_v17, -1000000.0 }
 0x3ac   :  { %v519_v49 = vsel %vm518_vm9, %v517_v18, -inf }
 0x3ad   :  { %520 = vmax.xlane.f32.xlu0 %v519_v49 }
 0x3d5   :  { %v885_v6 = vpop.xlane.xlu1 %884 }
 0x3d6   :  { %v886_v7 = vsub.f32 %v1464_v19, %v885_v6  ;;  %v531_v19 = vld [vmem:[%s1545_s3] sm:$0xff]  ;;  %s1171_s3 = scalar_lea.vmem %s991_s23, 128 }
 0x3d7   :  { %1058 = vmatpush3.msra.mxu1 %v531_v19  ;;  %p1172_p5 = scmp.ne.s32.totalorder %s991_s23, %s1171_s3  ;;  %p1177_p7 = scmp.lt.s32.totalorder %s1171_s3, %s1171_s3 }
 0x3d8   :  { %v887_v20 = vmul.f32 1.442695, %v886_v7 }
 0x3d9   :  { %p1178_p8 = por %p1177_p7, %p1176_p6 }
 0x3db   :  { %p1179_p9 = pnand %p1178_p8, %p1172_p5 }
 0x43a   :  { %v521_v24 = vpop.xlane.xlu0 %520 }
 0x43b   :  { %v522_v27 = vsub.f32 %v517_v18, %v521_v24 }
 0x43d   :  { %v523_v37 = vmul.f32 1.442695, %v522_v27 }
 0x43f   :  { %1151 = vpow2.f32 %v523_v37 }
 0x440   :  { %1153 = vpow2.f32 %v887_v20 }
 0x449   :  { %v1152_v45 = vpop.eup %1151 }
 0x44a   :  { %v525_v21 = vsel %vm518_vm9, %v1152_v45, 0.0  ;;  %v1154_v22 = vpop.eup %1153 }
 0x44b   :  { %526 = vadd.xlane.f32.xlu0 %v525_v21  ;;  %v889_v23 = vsel %vm518_vm9, %v1154_v22, 0.0 }
 0x44f   :  { %890 = vadd.xlane.f32.xlu0 %v889_v23 }
 0x4d8   :  { %v527_v30 = vpop.xlane.xlu0 %526 }
 0x4d9   :  { %1155 = vrcp.f32 %v527_v30 }
 0x4dc   :  { %v891_v31 = vpop.xlane.xlu0 %890 }
 0x4dd   :  { %1157 = vrcp.f32 %v891_v31 }
 0x4e3   :  { %v1156_v32 = vpop.eup %1155 }
 0x4e4   :  { %v529_v50 = vmul.f32 %v1156_v32, %v1152_v45 }
 0x4e6   :  { %530 = vst.msk [vmem:[#allocation8] sm:$0xf] %vm518_vm9, %v529_v50  ;;  %1060 = vmatmul.mubr.msk.f32.vlgmr.msra.gmra.mrb[4].mxu1 %vm143_vm2, %v529_v50 }
 0x4e7   :  { %v1158_v33 = vpop.eup %1157 }
 0x4e8   :  { %v893_v34 = vmul.f32 %v1158_v33, %v1154_v22 }
 0x4ea   :  { %895 = vst.msk [vmem:[#allocation8 + $0x4] sm:$0xf] %vm518_vm9, %v893_v34  ;;  %1065 = vmatmul.mubr.msk.f32.vlgmr.msra.gmra.mrb[4].mxu0 %vm143_vm2, %v893_v34 }
 0x4eb   :  { %1182 = shalt.err (!%p1179_p9)
}
 0x4ec   :  { %s1183_s26 = scalar_lea.hbm %s1550_s8, 128 }
 0x4ed   :  { %p1184_p10 = scmp.ne.s32.totalorder %s1550_s8, %s1183_s26  ;;  %p1187_p11 = scmp.lt.u32.totalorder %s1183_s26, %s1550_s8 }
 0x4ef   :  { %p1189_p12 = pnand %p1187_p11, %p1184_p10 }
 0x4f1   :  { %1192 = shalt.err (!%p1189_p12)
}
 0x4f2   :  { %s1228_s30 = smov 64   ;;  %s1229_s9 = smov 4   ;;  %vm605_vm12 = vcmask 27648  }
 0x4f3   :  { %996 = dma.vmem_to_hbm [thread:$0]  %s991_s23, 128, %s1550_s8, [#allocation9], %s1228_s30, %s1228_s30, %s1229_s9  }
 0x4f4   :  { %s1230_s11 = smov [#allocation6]  }
 0x4f5   :  { %s978_s12 = sshll.u32 %s1230_s11, 4  ;;  %s979_s12 = int_to_ptr.vmem [resolvable:$true] %s978_s12 }
 0x4f6   :  { %s1193_s0 = scalar_lea.vmem %s979_s12, 128  ;;  %p1198_p0 = scmp.lt.s32.totalorder %s979_s12, %s979_s12 }
 0x4f7   :  { %p1194_p13 = scmp.ne.s32.totalorder %s979_s12, %s1193_s0  ;;  %p1199_p1 = scmp.lt.s32.totalorder %s1193_s0, %s1193_s0 }
 0x4f9   :  { %p1200_p2 = por %p1199_p1, %p1198_p0 }
 0x4fb   :  { %p1201_p3 = pnand %p1200_p2, %p1194_p13 }
 0x5b9   :  { %v601_v35 = vpop.f32.mrb[4].mxu1 }
 0x5ba   :  { %606 = vst.msk [vmem:[#allocation6] sm:$0xf] %vm605_vm12, %v601_v35  ;;  %v1061_v36 = vpop.f32.mrb[5].mxu1 }
 0x5bd   :  { %v967_v40 = vpop.f32.mrb[4].mxu0 }
 0x5be   :  { %972 = vst.msk [vmem:[#allocation6 + $0x4] sm:$0xf] %vm605_vm12, %v967_v40  ;;  %v1066_v41 = vpop.f32.mrb[5].mxu0 }
 0x5bf   :  { %1204 = shalt.err (!%p1201_p3)
}
 0x5c0   :  { %s1205_s8 = scalar_lea.hbm %s1549_s7, 128 }
 0x5c1   :  { %p1206_p4 = scmp.ne.s32.totalorder %s1549_s7, %s1205_s8  ;;  %p1209_p5 = scmp.lt.u32.totalorder %s1205_s8, %s1549_s7 }
 0x5c3   :  { %p1211_p6 = pnand %p1209_p5, %p1206_p4 }
 0x5c5   :  { %1214 = shalt.err (!%p1211_p6)
}
 0x5c6   :  { %984 = dma.vmem_to_hbm [thread:$0]  %s979_s12, 128, %s1549_s7, [#allocation7], %s1228_s30, %s1228_s30, %s1229_s9  }
 0x5c7   :  { %1217 = dma.done.wait [#allocation7], 128  }
 0x5c8   :  { %1218 = vsyncadd [#allocation7], 4294967168 }
 0x5c9   :  { %1219 = dma.done.wait [#allocation9], 128  }
 0x5ca   :  { %1220 = vsyncadd [#allocation9], 4294967168 }
 0x5cb   :  { %1003 = vsyncpa [#allocation7], 1 }
 0x5cc   :  { %1004 = vsyncpa [#allocation9], 1 }

</bundles_post_ra>
